<compile_context>
chip_gen: v7x
topology: tpu7x:2x2x1
jax: 0.10.0
libtpu: 0.0.40
codegen_flags: <defaults>
</compile_context>

<pallas_src>
import functools
import math

import jax
import jax.numpy as jnp
from jax import lax
from jax.experimental import pallas as pl
from jax.experimental.pallas import tpu as pltpu


def _pick_tile(n, max_tile):
    """Largest power-of-two tile <= max_tile dividing n (fallback: n itself)."""
    if n <= max_tile:
        return n
    t = max_tile
    while t >= 8:
        if n % t == 0:
            return t
        t //= 2
    return n


def _vmem_budget(*byte_terms):
    """Per-kernel VMEM request: 2x the computed footprint, clamped to
    [8 MiB, 48 MiB] so the same plan carries across v5e/v6e/v7x."""
    need = int(sum(byte_terms))
    return int(min(48 * 1024 * 1024, max(8 * 1024 * 1024, 2 * need)))


# -----------------------------------------------------------------------------
# Kernel 1: fused Q/K/V projection (full-width matmuls, lane-dense outputs).
# -----------------------------------------------------------------------------
def _qkv_proj_kernel(xq_ref, xk_ref, xv_ref,
                     wq_ref, bq_ref, wk_ref, bk_ref, wv_ref, bv_ref,
                     qo_ref, ko_ref, vo_ref):
    def proj(x_ref, w_ref, b_ref, o_ref):
        acc = jnp.dot(x_ref[0], w_ref[...],
                      preferred_element_type=jnp.float32)      # (ts, D) f32
        o_ref[0] = (acc + b_ref[...]).astype(o_ref.dtype)

    proj(xq_ref, wq_ref, bq_ref, qo_ref)
    proj(xk_ref, wk_ref, bk_ref, ko_ref)
    proj(xv_ref, wv_ref, bv_ref, vo_ref)


def _qkv_projection(xq, xk, xv, wq, bq, wk, bk, wv, bv, *, ts, out_dtype):
    B, S, D = xq.shape
    itm = jnp.dtype(out_dtype).itemsize

    x_spec = pl.BlockSpec((1, ts, D), lambda b, si: (b, si, 0))
    # Grid-invariant weights/biases: whole-array resident in VMEM (single DMA,
    # no double-buffer waste).
    w_spec = pl.BlockSpec(memory_space=pltpu.MemorySpace.VMEM)
    b_spec = pl.BlockSpec(memory_space=pltpu.MemorySpace.VMEM)

    flops = 3 * 2 * B * S * D * D
    bytes_accessed = 6 * B * S * D * itm + 3 * D * D * itm + 3 * D * 4
    vmem = _vmem_budget(12 * ts * D * itm,      # 3 in + 3 out tiles, 2 buffers
                        3 * D * D * itm,        # resident weights
                        3 * D * 4,              # resident biases (f32)
                        3 * ts * D * 4)         # f32 accumulators

    out_sds = jax.ShapeDtypeStruct((B, S, D), out_dtype)
    return pl.pallas_call(
        _qkv_proj_kernel,
        out_shape=(out_sds, out_sds, out_sds),
        grid_spec=pltpu.PrefetchScalarGridSpec(
            num_scalar_prefetch=0,
            grid=(B, S // ts),
            in_specs=[x_spec, x_spec, x_spec,
                      w_spec, b_spec, w_spec, b_spec, w_spec, b_spec],
            out_specs=(x_spec, x_spec, x_spec)),
        compiler_params=pltpu.CompilerParams(
            dimension_semantics=("parallel", "parallel"),
            vmem_limit_bytes=vmem),
        cost_estimate=pl.CostEstimate(flops=int(flops), transcendentals=0,
                                      bytes_accessed=int(bytes_accessed)),
    )(xq, xk, xv, wq, bq, wk, bk, wv, bv)


# -----------------------------------------------------------------------------
# Kernel 2: flash-style attention (online softmax, no (H, S, S) tensor).
# -----------------------------------------------------------------------------
def _flash_attn_kernel(q_ref, k_ref, v_ref, o_ref, m_ref, l_ref, acc_ref):
    kv = pl.program_id(3)

    @pl.when(kv == 0)
    def _init():
        m_ref[...] = jnp.full_like(m_ref, -jnp.inf)
        l_ref[...] = jnp.zeros_like(l_ref)
        acc_ref[...] = jnp.zeros_like(acc_ref)

    q = q_ref[0, 0]                        # (tq, n_d), compute dtype
    k = k_ref[0, 0]                        # (tk, n_d)
    v = v_ref[0, 0]                        # (tk, n_d)

    # q . k^T contracting the head-feature dim directly (no explicit k.T).
    # The 1/sqrt(n_d) scale is pre-folded into wq/bq by the wrapper.
    s = lax.dot_general(q, k, (((1,), (1,)), ((), ())),
                        preferred_element_type=jnp.float32)    # (tq, tk) f32

    # TODO(synk): optional `mask` argument of the PyTorch forward is not
    # implemented (the reference forward is exercised with mask=None).

    m_prev = m_ref[...]
    m_new = jnp.maximum(m_prev, jnp.max(s, axis=-1, keepdims=True))
    alpha = jnp.exp(m_prev - m_new)                            # f32 elementwise
    p = jnp.exp(s - m_new)
    l_ref[...] = alpha * l_ref[...] + jnp.sum(p, axis=-1, keepdims=True)
    acc_ref[...] = alpha * acc_ref[...] + jnp.dot(
        p.astype(v.dtype), v, preferred_element_type=jnp.float32)
    m_ref[...] = m_new

    @pl.when(kv == pl.num_programs(3) - 1)
    def _finalize():
        # Exact divide: denominator is only (tq, 1), exactness is free.
        o_ref[0, 0] = (acc_ref[...] / l_ref[...]).astype(o_ref.dtype)


def _flash_attention(qh, kh, vh, *, tq, tk):
    B, H, S, n_d = qh.shape
    itm = jnp.dtype(qh.dtype).itemsize

    q_spec = pl.BlockSpec((1, 1, tq, n_d), lambda b, h, qi, ki: (b, h, qi, 0))
    kv_spec = pl.BlockSpec((1, 1, tk, n_d), lambda b, h, qi, ki: (b, h, ki, 0))

    flops = 4 * B * H * S * S * n_d
    transcendentals = B * H * S * S
    bytes_accessed = 4 * B * H * S * n_d * itm
    vmem = _vmem_budget(2 * (tq + 2 * tk) * n_d * itm,   # q/k/v tiles, 2 buffers
                        2 * tq * n_d * itm,              # out tile, 2 buffers
                        (2 * tq + tq * n_d) * 4,         # m/l/acc scratch
                        4 * tq * tk * 4)                 # score intermediates

    return pl.pallas_call(
        _flash_attn_kernel,
        out_shape=jax.ShapeDtypeStruct((B, H, S, n_d), qh.dtype),
        grid_spec=pltpu.PrefetchScalarGridSpec(
            num_scalar_prefetch=0,
            grid=(B, H, S // tq, S // tk),
            in_specs=[q_spec, kv_spec, kv_spec],
            out_specs=q_spec,
            scratch_shapes=[pltpu.VMEM((tq, 1), jnp.float32),
                            pltpu.VMEM((tq, 1), jnp.float32),
                            pltpu.VMEM((tq, n_d), jnp.float32)]),
        compiler_params=pltpu.CompilerParams(
            dimension_semantics=("parallel", "parallel", "parallel",
                                 "arbitrary"),
            vmem_limit_bytes=vmem),
        cost_estimate=pl.CostEstimate(flops=int(flops),
                                      transcendentals=int(transcendentals),
                                      bytes_accessed=int(bytes_accessed)),
    )(qh, kh, vh)


# -----------------------------------------------------------------------------
# Kernel 3: output projection (one full-K, full-N matmul).
# -----------------------------------------------------------------------------
def _linear_kernel(x_ref, w_ref, b_ref, o_ref):
    acc = jnp.dot(x_ref[0], w_ref[...], preferred_element_type=jnp.float32)
    o_ref[0] = (acc + b_ref[...]).astype(o_ref.dtype)


def _linear(x, w, b, *, ts, out_dtype):
    B, S, D = x.shape
    N = w.shape[1]
    itm_in = jnp.dtype(x.dtype).itemsize
    itm_out = jnp.dtype(out_dtype).itemsize

    x_spec = pl.BlockSpec((1, ts, D), lambda bi, si: (bi, si, 0))
    o_spec = pl.BlockSpec((1, ts, N), lambda bi, si: (bi, si, 0))
    w_spec = pl.BlockSpec(memory_space=pltpu.MemorySpace.VMEM)
    b_spec = pl.BlockSpec(memory_space=pltpu.MemorySpace.VMEM)

    flops = 2 * B * S * D * N
    bytes_accessed = B * S * (D * itm_in + N * itm_out) + D * N * itm_in + N * 4
    vmem = _vmem_budget(2 * ts * D * itm_in, 2 * ts * N * itm_out,
                        D * N * itm_in, N * 4, ts * N * 4)

    return pl.pallas_call(
        _linear_kernel,
        out_shape=jax.ShapeDtypeStruct((B, S, N), out_dtype),
        grid_spec=pltpu.PrefetchScalarGridSpec(
            num_scalar_prefetch=0,
            grid=(B, S // ts),
            in_specs=[x_spec, w_spec, b_spec],
            out_specs=o_spec),
        compiler_params=pltpu.CompilerParams(
            dimension_semantics=("parallel", "parallel"),
            vmem_limit_bytes=vmem),
        cost_estimate=pl.CostEstimate(flops=int(flops), transcendentals=0,
                                      bytes_accessed=int(bytes_accessed)),
    )(x, w, b)


# -----------------------------------------------------------------------------
# Wrapper: mirrors MultiHeadAttention.forward (mask=None path).
# -----------------------------------------------------------------------------
def multi_head_attention(q, k, v, params, n_head, compute_dtype=jnp.bfloat16):
    """q, k, v: [B, S, D].  params: (in, out)-layout weights + biases.

    compute_dtype: MXU operand dtype.  bfloat16 (default) hits the native MXU
    path on v5e/v6e/v7x and halves weight/activation DMA bytes; accumulation
    and all softmax elementwise math stay float32 (v5e has no bf16 VPU/EUP).
    Pass jnp.float32 for tighter numerics.
    """
    B, S, D = q.shape
    assert D % n_head == 0
    n_d = D // n_head
    scale = 1.0 / math.sqrt(n_d)
    cdt = compute_dtype

    # Weight prep (runs once in the wrapper):
    #   * 1/sqrt(n_d) softmax scale folded into wq/bq (zero runtime cost).
    #   * single wrapper-side cast to the MXU dtype (not per grid step).
    #   * biases kept f32 (added to f32 accumulators on the VPU).
    wq = (params["wq"] * scale).astype(cdt)
    wk = params["wk"].astype(cdt)
    wv = params["wv"].astype(cdt)
    wo = params["wo"].astype(cdt)
    bq = (params["bq"] * scale).astype(jnp.float32).reshape(1, D)
    bk = params["bk"].astype(jnp.float32).reshape(1, D)
    bv = params["bv"].astype(jnp.float32).reshape(1, D)
    bo = params["bo"].astype(jnp.float32).reshape(1, D)

    ts = _pick_tile(S, 256)   # projection / output-projection row tile
    tq = _pick_tile(S, 128)   # attention q tile
    tk = _pick_tile(S, 128)   # attention kv tile

    # 1) Full-width fused Q/K/V projections -> (B, S, D), lane-dense last dim.
    qc, kc, vc = (t.astype(cdt) for t in (q, k, v))
    qp, kp, vp = _qkv_projection(qc, kc, vc, wq, bq, wk, bk, wv, bv,
                                 ts=ts, out_dtype=cdt)

    # 2) Head-major views only for the attention math (plain XLA reshape +
    #    transpose between the pallas_calls).
    # TODO(synk): for production n_d (multiples of 128) fold this head
    # split/merge into the flash kernel's BlockSpecs (block the last dim by
    # n_d) to skip the extra HBM pass; at n_d < 128 that would violate the
    # (8,128) tiling rule, so it is done here in the wrapper.
    def split_heads(x):
        return x.reshape(B, S, n_head, n_d).transpose(0, 2, 1, 3)

    ctx = _flash_attention(split_heads(qp), split_heads(kp), split_heads(vp),
                           tq=tq, tk=tk)                       # (B, H, S, n_d)

    # 3) Merge heads back to a lane-dense (B, S, D) slab and run ONE full-K
    #    output projection.
    ctx = ctx.transpose(0, 2, 1, 3).reshape(B, S, D)
    return _linear(ctx, wo, bo, ts=ts, out_dtype=q.dtype)


def _reference_mha(q, k, v, params, n_head):
    """Pure-JAX (f32) reference mirroring the PyTorch forward."""
    B, S, D = q.shape
    n_d = D // n_head

    def lin(x, w, b):
        return x @ w + b

    qp = lin(q, params["wq"], params["bq"])
    kp = lin(k, params["wk"], params["bk"])
    vp = lin(v, params["wv"], params["bv"])

    def split(x):
        return x.reshape(B, S, n_head, n_d).transpose(0, 2, 1, 3)

    qh, kh, vh = split(qp), split(kp), split(vp)
    score = jnp.einsum("bhqd,bhkd->bhqk", qh, kh) / math.sqrt(n_d)
    score = jax.nn.softmax(score, axis=-1)
    ctx = jnp.einsum("bhqk,bhkd->bhqd", score, vh)
    ctx = ctx.transpose(0, 2, 1, 3).reshape(B, S, D)
    return lin(ctx, params["wo"], params["bo"])


if __name__ == "__main__":
    B, S, D, H = 2, 8, 32, 4  # batch, seq, d_model, n_head

    key = jax.random.PRNGKey(0)
    keys = jax.random.split(key, 11)
    bound = 1.0 / math.sqrt(D)  # PyTorch Linear default init bound

    def uni(kk, shape):
        return jax.random.uniform(kk, shape, jnp.float32, -bound, bound)

    # Weights stored in (in, out) layout (pre-transposed vs torch's (out, in)).
    params = {
        "wq": uni(keys[0], (D, D)), "bq": uni(keys[1], (D,)),
        "wk": uni(keys[2], (D, D)), "bk": uni(keys[3], (D,)),
        "wv": uni(keys[4], (D, D)), "bv": uni(keys[5], (D,)),
        "wo": uni(keys[6], (D, D)), "bo": uni(keys[7], (D,)),
    }

    q = jax.random.normal(keys[8], (B, S, D), jnp.float32)
    k = jax.random.normal(keys[9], (B, S, D), jnp.float32)
    v = jax.random.normal(keys[10], (B, S, D), jnp.float32)

    mha = jax.jit(functools.partial(multi_head_attention, n_head=H))
    out = jax.block_until_ready(mha(q, k, v, params))

    ref = _reference_mha(q, k, v, params, H)
    assert out.shape == (B, S, D)
    # Tolerance covers bf16 MXU-operand rounding (weights/activations bf16;
    # accumulation and softmax stay f32).  Real head/layout bugs give O(1)
    # errors, far above this bound.
    max_err = float(jnp.max(jnp.abs(out - ref)))
    assert jnp.allclose(out, ref, atol=3e-2, rtol=3e-2), (
        f"mismatch vs reference (max abs err {max_err:.3e})")

    print("KERNEL_OK")
</pallas_src>

<mosaic_0001>
module attributes {stable_mosaic.version = 11 : i64} {
  func.func @_qkv_proj_kernel(%arg0: i32, %arg1: i32, %arg2: memref<1x8x32xbf16, #tpu.memory_space<vmem>>, %arg3: memref<1x8x32xbf16, #tpu.memory_space<vmem>>, %arg4: memref<1x8x32xbf16, #tpu.memory_space<vmem>>, %arg5: memref<32x32xbf16, #tpu.memory_space<vmem>>, %arg6: memref<1x32xf32, #tpu.memory_space<vmem>>, %arg7: memref<32x32xbf16, #tpu.memory_space<vmem>>, %arg8: memref<1x32xf32, #tpu.memory_space<vmem>>, %arg9: memref<32x32xbf16, #tpu.memory_space<vmem>>, %arg10: memref<1x32xf32, #tpu.memory_space<vmem>>, %arg11: memref<1x8x32xbf16, #tpu.memory_space<vmem>>, %arg12: memref<1x8x32xbf16, #tpu.memory_space<vmem>>, %arg13: memref<1x8x32xbf16, #tpu.memory_space<vmem>>) attributes {dimension_semantics = [#tpu.dimension_semantics<parallel>, #tpu.dimension_semantics<parallel>], iteration_bounds = array<i64: 2, 1>, scalar_prefetch = 0 : i64, scratch_operands = 0 : i64, tpu.core_type = #tpu.core_type<tc>, window_params = [{transform_indices = @transform_0, window_bounds = array<i64: 1, 8, 32>}, {transform_indices = @transform_1, window_bounds = array<i64: 1, 8, 32>}, {transform_indices = @transform_2, window_bounds = array<i64: 1, 8, 32>}, {pipeline_mode = #tpu.pipeline_mode<synchronous>, transform_indices = @transform_3, window_bounds = array<i64: 32, 32>}, {pipeline_mode = #tpu.pipeline_mode<synchronous>, transform_indices = @transform_4, window_bounds = array<i64: 1, 32>}, {pipeline_mode = #tpu.pipeline_mode<synchronous>, transform_indices = @transform_5, window_bounds = array<i64: 32, 32>}, {pipeline_mode = #tpu.pipeline_mode<synchronous>, transform_indices = @transform_6, window_bounds = array<i64: 1, 32>}, {pipeline_mode = #tpu.pipeline_mode<synchronous>, transform_indices = @transform_7, window_bounds = array<i64: 32, 32>}, {pipeline_mode = #tpu.pipeline_mode<synchronous>, transform_indices = @transform_8, window_bounds = array<i64: 1, 32>}, {transform_indices = @transform_9, window_bounds = array<i64: 1, 8, 32>}, {transform_indices = @transform_10, window_bounds = array<i64: 1, 8, 32>}, {transform_indices = @transform_11, window_bounds = array<i64: 1, 8, 32>}]} {
    %c0 = arith.constant 0 : index
    %c0_0 = arith.constant 0 : index
    %c0_1 = arith.constant 0 : index
    %0 = vector.load %arg2[%c0, %c0_0, %c0_1] : memref<1x8x32xbf16, #tpu.memory_space<vmem>>, vector<1x8x32xbf16>
    %1 = vector.shape_cast %0 : vector<1x8x32xbf16> to vector<8x32xbf16>
    %c0_2 = arith.constant 0 : index
    %c0_3 = arith.constant 0 : index
    %2 = vector.load %arg5[%c0_2, %c0_3] : memref<32x32xbf16, #tpu.memory_space<vmem>>, vector<32x32xbf16>
    %cst = arith.constant dense<0.000000e+00> : vector<8x32xf32>
    %3 = tpu.matmul %1, %2, %cst {dimension_numbers = #tpu.dot_dimension_numbers<[1], [0], [0], [1], [0, 0, 1, 1], [], []>} : vector<8x32xbf16>, vector<32x32xbf16>, vector<8x32xf32> -> vector<8x32xf32>
    %c0_4 = arith.constant 0 : index
    %c0_5 = arith.constant 0 : index
    %4 = vector.load %arg6[%c0_4, %c0_5] : memref<1x32xf32, #tpu.memory_space<vmem>>, vector<1x32xf32>
    %5 = vector.broadcast %4 : vector<1x32xf32> to vector<8x32xf32>
    %6 = arith.addf %3, %5 : vector<8x32xf32>
    %7 = arith.truncf %6 : vector<8x32xf32> to vector<8x32xbf16>
    %c0_6 = arith.constant 0 : index
    %c0_7 = arith.constant 0 : index
    %c0_8 = arith.constant 0 : index
    %8 = vector.load %arg11[%c0_6, %c0_7, %c0_8] : memref<1x8x32xbf16, #tpu.memory_space<vmem>>, vector<1x8x32xbf16>
    %9 = vector.shape_cast %8 : vector<1x8x32xbf16> to vector<8x32xbf16>
    %10 = vector.shape_cast %7 : vector<8x32xbf16> to vector<1x8x32xbf16>
    tpu.vector_store %arg11[%c0_6, %c0_7, %c0_8], %10 {strides = array<i32>} : memref<1x8x32xbf16, #tpu.memory_space<vmem>>, vector<1x8x32xbf16>,
    %c0_9 = arith.constant 0 : index
    %c0_10 = arith.constant 0 : index
    %c0_11 = arith.constant 0 : index
    %11 = vector.load %arg3[%c0_9, %c0_10, %c0_11] : memref<1x8x32xbf16, #tpu.memory_space<vmem>>, vector<1x8x32xbf16>
    %12 = vector.shape_cast %11 : vector<1x8x32xbf16> to vector<8x32xbf16>
    %c0_12 = arith.constant 0 : index
    %c0_13 = arith.constant 0 : index
    %13 = vector.load %arg7[%c0_12, %c0_13] : memref<32x32xbf16, #tpu.memory_space<vmem>>, vector<32x32xbf16>
    %cst_14 = arith.constant dense<0.000000e+00> : vector<8x32xf32>
    %14 = tpu.matmul %12, %13, %cst_14 {dimension_numbers = #tpu.dot_dimension_numbers<[1], [0], [0], [1], [0, 0, 1, 1], [], []>} : vector<8x32xbf16>, vector<32x32xbf16>, vector<8x32xf32> -> vector<8x32xf32>
    %c0_15 = arith.constant 0 : index
    %c0_16 = arith.constant 0 : index
    %15 = vector.load %arg8[%c0_15, %c0_16] : memref<1x32xf32, #tpu.memory_space<vmem>>, vector<1x32xf32>
    %16 = vector.broadcast %15 : vector<1x32xf32> to vector<8x32xf32>
    %17 = arith.addf %14, %16 : vector<8x32xf32>
    %18 = arith.truncf %17 : vector<8x32xf32> to vector<8x32xbf16>
    %c0_17 = arith.constant 0 : index
    %c0_18 = arith.constant 0 : index
    %c0_19 = arith.constant 0 : index
    %19 = vector.load %arg12[%c0_17, %c0_18, %c0_19] : memref<1x8x32xbf16, #tpu.memory_space<vmem>>, vector<1x8x32xbf16>
    %20 = vector.shape_cast %19 : vector<1x8x32xbf16> to vector<8x32xbf16>
    %21 = vector.shape_cast %18 : vector<8x32xbf16> to vector<1x8x32xbf16>
    tpu.vector_store %arg12[%c0_17, %c0_18, %c0_19], %21 {strides = array<i32>} : memref<1x8x32xbf16, #tpu.memory_space<vmem>>, vector<1x8x32xbf16>,
    %c0_20 = arith.constant 0 : index
    %c0_21 = arith.constant 0 : index
    %c0_22 = arith.constant 0 : index
    %22 = vector.load %arg4[%c0_20, %c0_21, %c0_22] : memref<1x8x32xbf16, #tpu.memory_space<vmem>>, vector<1x8x32xbf16>
    %23 = vector.shape_cast %22 : vector<1x8x32xbf16> to vector<8x32xbf16>
    %c0_23 = arith.constant 0 : index
    %c0_24 = arith.constant 0 : index
    %24 = vector.load %arg9[%c0_23, %c0_24] : memref<32x32xbf16, #tpu.memory_space<vmem>>, vector<32x32xbf16>
    %cst_25 = arith.constant dense<0.000000e+00> : vector<8x32xf32>
    %25 = tpu.matmul %23, %24, %cst_25 {dimension_numbers = #tpu.dot_dimension_numbers<[1], [0], [0], [1], [0, 0, 1, 1], [], []>} : vector<8x32xbf16>, vector<32x32xbf16>, vector<8x32xf32> -> vector<8x32xf32>
    %c0_26 = arith.constant 0 : index
    %c0_27 = arith.constant 0 : index
    %26 = vector.load %arg10[%c0_26, %c0_27] : memref<1x32xf32, #tpu.memory_space<vmem>>, vector<1x32xf32>
    %27 = vector.broadcast %26 : vector<1x32xf32> to vector<8x32xf32>
    %28 = arith.addf %25, %27 : vector<8x32xf32>
    %29 = arith.truncf %28 : vector<8x32xf32> to vector<8x32xbf16>
    %c0_28 = arith.constant 0 : index
    %c0_29 = arith.constant 0 : index
    %c0_30 = arith.constant 0 : index
    %30 = vector.load %arg13[%c0_28, %c0_29, %c0_30] : memref<1x8x32xbf16, #tpu.memory_space<vmem>>, vector<1x8x32xbf16>
    %31 = vector.shape_cast %30 : vector<1x8x32xbf16> to vector<8x32xbf16>
    %32 = vector.shape_cast %29 : vector<8x32xbf16> to vector<1x8x32xbf16>
    tpu.vector_store %arg13[%c0_28, %c0_29, %c0_30], %32 {strides = array<i32>} : memref<1x8x32xbf16, #tpu.memory_space<vmem>>, vector<1x8x32xbf16>,
    return
  }
  func.func @transform_0(%arg0: i32, %arg1: i32) -> (i32, i32, i32) {
    %c0_i32 = arith.constant 0 : i32
    %c0_i32_0 = arith.constant 0 : i32
    return %arg0, %arg1, %c0_i32 : i32, i32, i32
  }
  func.func @transform_1(%arg0: i32, %arg1: i32) -> (i32, i32, i32) {
    %c0_i32 = arith.constant 0 : i32
    %c0_i32_0 = arith.constant 0 : i32
    return %arg0, %arg1, %c0_i32 : i32, i32, i32
  }
  func.func @transform_2(%arg0: i32, %arg1: i32) -> (i32, i32, i32) {
    %c0_i32 = arith.constant 0 : i32
    %c0_i32_0 = arith.constant 0 : i32
    return %arg0, %arg1, %c0_i32 : i32, i32, i32
  }
  func.func @transform_3(%arg0: i32, %arg1: i32) -> (i32, i32) {
    %c0_i32 = arith.constant 0 : i32
    %c0_i32_0 = arith.constant 0 : i32
    %c0_i32_1 = arith.constant 0 : i32
    return %c0_i32, %c0_i32_0 : i32, i32
  }
  func.func @transform_4(%arg0: i32, %arg1: i32) -> (i32, i32) {
    %c0_i32 = arith.constant 0 : i32
    %c0_i32_0 = arith.constant 0 : i32
    %c0_i32_1 = arith.constant 0 : i32
    return %c0_i32, %c0_i32_0 : i32, i32
  }
  func.func @transform_5(%arg0: i32, %arg1: i32) -> (i32, i32) {
    %c0_i32 = arith.constant 0 : i32
    %c0_i32_0 = arith.constant 0 : i32
    %c0_i32_1 = arith.constant 0 : i32
    return %c0_i32, %c0_i32_0 : i32, i32
  }
  func.func @transform_6(%arg0: i32, %arg1: i32) -> (i32, i32) {
    %c0_i32 = arith.constant 0 : i32
    %c0_i32_0 = arith.constant 0 : i32
    %c0_i32_1 = arith.constant 0 : i32
    return %c0_i32, %c0_i32_0 : i32, i32
  }
  func.func @transform_7(%arg0: i32, %arg1: i32) -> (i32, i32) {
    %c0_i32 = arith.constant 0 : i32
    %c0_i32_0 = arith.constant 0 : i32
    %c0_i32_1 = arith.constant 0 : i32
    return %c0_i32, %c0_i32_0 : i32, i32
  }
  func.func @transform_8(%arg0: i32, %arg1: i32) -> (i32, i32) {
    %c0_i32 = arith.constant 0 : i32
    %c0_i32_0 = arith.constant 0 : i32
    %c0_i32_1 = arith.constant 0 : i32
    return %c0_i32, %c0_i32_0 : i32, i32
  }
  func.func @transform_9(%arg0: i32, %arg1: i32) -> (i32, i32, i32) {
    %c0_i32 = arith.constant 0 : i32
    %c0_i32_0 = arith.constant 0 : i32
    return %arg0, %arg1, %c0_i32 : i32, i32, i32
  }
  func.func @transform_10(%arg0: i32, %arg1: i32) -> (i32, i32, i32) {
    %c0_i32 = arith.constant 0 : i32
    %c0_i32_0 = arith.constant 0 : i32
    return %arg0, %arg1, %c0_i32 : i32, i32, i32
  }
  func.func @transform_11(%arg0: i32, %arg1: i32) -> (i32, i32, i32) {
    %c0_i32 = arith.constant 0 : i32
    %c0_i32_0 = arith.constant 0 : i32
    return %arg0, %arg1, %c0_i32 : i32, i32, i32
  }
}

module attributes {stable_mosaic.version = 11 : i64} {
  func.func @_flash_attn_kernel(%arg0: i32, %arg1: i32, %arg2: i32, %arg3: i32, %arg4: memref<1x1x8x8xbf16, #tpu.memory_space<vmem>>, %arg5: memref<1x1x8x8xbf16, #tpu.memory_space<vmem>>, %arg6: memref<1x1x8x8xbf16, #tpu.memory_space<vmem>>, %arg7: memref<1x1x8x8xbf16, #tpu.memory_space<vmem>>, %arg8: memref<8x1xf32, #tpu.memory_space<vmem>>, %arg9: memref<8x1xf32, #tpu.memory_space<vmem>>, %arg10: memref<8x8xf32, #tpu.memory_space<vmem>>) attributes {dimension_semantics = [#tpu.dimension_semantics<parallel>, #tpu.dimension_semantics<parallel>, #tpu.dimension_semantics<parallel>, #tpu.dimension_semantics<arbitrary>], iteration_bounds = array<i64: 2, 4, 1, 1>, scalar_prefetch = 0 : i64, scratch_operands = 3 : i64, tpu.core_type = #tpu.core_type<tc>, window_params = [{transform_indices = @transform_0, window_bounds = array<i64: 1, 1, 8, 8>}, {transform_indices = @transform_1, window_bounds = array<i64: 1, 1, 8, 8>}, {transform_indices = @transform_2, window_bounds = array<i64: 1, 1, 8, 8>}, {transform_indices = @transform_3, window_bounds = array<i64: 1, 1, 8, 8>}]} {
    %c0_i32 = arith.constant 0 : i32
    %0 = arith.cmpi eq, %arg3, %c0_i32 : i32
    %1 = arith.extui %0 : i1 to i32
    %c0_i32_0 = arith.constant 0 : i32
    %2 = arith.cmpi ne, %1, %c0_i32_0 : i32
    scf.if %2 {
      %cst_29 = arith.constant 0xFF800000 : f32
      %36 = vector.broadcast %cst_29 : f32 to vector<8x1xf32>
      %c0_30 = arith.constant 0 : index
      %c0_31 = arith.constant 0 : index
      %37 = vector.load %arg8[%c0_30, %c0_31] : memref<8x1xf32, #tpu.memory_space<vmem>>, vector<8x1xf32>
      tpu.vector_store %arg8[%c0_30, %c0_31], %36 {strides = array<i32>} : memref<8x1xf32, #tpu.memory_space<vmem>>, vector<8x1xf32>,
      %cst_32 = arith.constant 0.000000e+00 : f32
      %38 = vector.broadcast %cst_32 : f32 to vector<8x1xf32>
      %c0_33 = arith.constant 0 : index
      %c0_34 = arith.constant 0 : index
      %39 = vector.load %arg9[%c0_33, %c0_34] : memref<8x1xf32, #tpu.memory_space<vmem>>, vector<8x1xf32>
      tpu.vector_store %arg9[%c0_33, %c0_34], %38 {strides = array<i32>} : memref<8x1xf32, #tpu.memory_space<vmem>>, vector<8x1xf32>,
      %cst_35 = arith.constant 0.000000e+00 : f32
      %40 = vector.broadcast %cst_35 : f32 to vector<8x8xf32>
      %c0_36 = arith.constant 0 : index
      %c0_37 = arith.constant 0 : index
      %41 = vector.load %arg10[%c0_36, %c0_37] : memref<8x8xf32, #tpu.memory_space<vmem>>, vector<8x8xf32>
      tpu.vector_store %arg10[%c0_36, %c0_37], %40 {strides = array<i32>} : memref<8x8xf32, #tpu.memory_space<vmem>>, vector<8x8xf32>,
    } else {
    }
    %c0 = arith.constant 0 : index
    %c0_1 = arith.constant 0 : index
    %c0_2 = arith.constant 0 : index
    %c0_3 = arith.constant 0 : index
    %3 = vector.load %arg4[%c0, %c0_1, %c0_2, %c0_3] : memref<1x1x8x8xbf16, #tpu.memory_space<vmem>>, vector<1x1x8x8xbf16>
    %4 = vector.shape_cast %3 : vector<1x1x8x8xbf16> to vector<8x8xbf16>
    %c0_4 = arith.constant 0 : index
    %c0_5 = arith.constant 0 : index
    %c0_6 = arith.constant 0 : index
    %c0_7 = arith.constant 0 : index
    %5 = vector.load %arg5[%c0_4, %c0_5, %c0_6, %c0_7] : memref<1x1x8x8xbf16, #tpu.memory_space<vmem>>, vector<1x1x8x8xbf16>
    %6 = vector.shape_cast %5 : vector<1x1x8x8xbf16> to vector<8x8xbf16>
    %c0_8 = arith.constant 0 : index
    %c0_9 = arith.constant 0 : index
    %c0_10 = arith.constant 0 : index
    %c0_11 = arith.constant 0 : index
    %7 = vector.load %arg6[%c0_8, %c0_9, %c0_10, %c0_11] : memref<1x1x8x8xbf16, #tpu.memory_space<vmem>>, vector<1x1x8x8xbf16>
    %8 = vector.shape_cast %7 : vector<1x1x8x8xbf16> to vector<8x8xbf16>
    %cst = arith.constant dense<0.000000e+00> : vector<8x8xf32>
    %9 = tpu.matmul %4, %6, %cst {dimension_numbers = #tpu.dot_dimension_numbers<[1], [1], [0], [0], [0, 0, 1, 0], [], []>} : vector<8x8xbf16>, vector<8x8xbf16>, vector<8x8xf32> -> vector<8x8xf32>
    %c0_12 = arith.constant 0 : index
    %c0_13 = arith.constant 0 : index
    %10 = vector.load %arg8[%c0_12, %c0_13] : memref<8x1xf32, #tpu.memory_space<vmem>>, vector<8x1xf32>
    %cst_14 = arith.constant dense<0xFF800000> : vector<8xf32>
    %11 = vector.multi_reduction <maximumf>, %9, %cst_14 [1] : vector<8x8xf32> to vector<8xf32>
    %12 = vector.shape_cast %11 : vector<8xf32> to vector<8x1xf32>
    %13 = arith.maximumf %10, %12 : vector<8x1xf32>
    %14 = arith.subf %10, %13 : vector<8x1xf32>
    %15 = math.exp %14 : vector<8x1xf32>
    %16 = vector.broadcast %13 : vector<8x1xf32> to vector<8x8xf32>
    %17 = arith.subf %9, %16 : vector<8x8xf32>
    %18 = math.exp %17 : vector<8x8xf32>
    %c0_15 = arith.constant 0 : index
    %c0_16 = arith.constant 0 : index
    %19 = vector.load %arg9[%c0_15, %c0_16] : memref<8x1xf32, #tpu.memory_space<vmem>>, vector<8x1xf32>
    %20 = arith.mulf %15, %19 : vector<8x1xf32>
    %cst_17 = arith.constant dense<0.000000e+00> : vector<8xf32>
    %21 = vector.multi_reduction <add>, %18, %cst_17 [1] : vector<8x8xf32> to vector<8xf32>
    %22 = vector.shape_cast %21 : vector<8xf32> to vector<8x1xf32>
    %23 = arith.addf %20, %22 : vector<8x1xf32>
    %c0_18 = arith.constant 0 : index
    %c0_19 = arith.constant 0 : index
    %24 = vector.load %arg9[%c0_18, %c0_19] : memref<8x1xf32, #tpu.memory_space<vmem>>, vector<8x1xf32>
    tpu.vector_store %arg9[%c0_18, %c0_19], %23 {strides = array<i32>} : memref<8x1xf32, #tpu.memory_space<vmem>>, vector<8x1xf32>,
    %c0_20 = arith.constant 0 : index
    %c0_21 = arith.constant 0 : index
    %25 = vector.load %arg10[%c0_20, %c0_21] : memref<8x8xf32, #tpu.memory_space<vmem>>, vector<8x8xf32>
    %26 = vector.broadcast %15 : vector<8x1xf32> to vector<8x8xf32>
    %27 = arith.mulf %26, %25 : vector<8x8xf32>
    %28 = arith.truncf %18 : vector<8x8xf32> to vector<8x8xbf16>
    %cst_22 = arith.constant dense<0.000000e+00> : vector<8x8xf32>
    %29 = tpu.matmul %28, %8, %cst_22 {dimension_numbers = #tpu.dot_dimension_numbers<[1], [0], [0], [1], [0, 0, 1, 1], [], []>} : vector<8x8xbf16>, vector<8x8xbf16>, vector<8x8xf32> -> vector<8x8xf32>
    %30 = arith.addf %27, %29 : vector<8x8xf32>
    %c0_23 = arith.constant 0 : index
    %c0_24 = arith.constant 0 : index
    %31 = vector.load %arg10[%c0_23, %c0_24] : memref<8x8xf32, #tpu.memory_space<vmem>>, vector<8x8xf32>
    tpu.vector_store %arg10[%c0_23, %c0_24], %30 {strides = array<i32>} : memref<8x8xf32, #tpu.memory_space<vmem>>, vector<8x8xf32>,
    %c0_25 = arith.constant 0 : index
    %c0_26 = arith.constant 0 : index
    %32 = vector.load %arg8[%c0_25, %c0_26] : memref<8x1xf32, #tpu.memory_space<vmem>>, vector<8x1xf32>
    tpu.vector_store %arg8[%c0_25, %c0_26], %13 {strides = array<i32>} : memref<8x1xf32, #tpu.memory_space<vmem>>, vector<8x1xf32>,
    %c0_i32_27 = arith.constant 0 : i32
    %33 = arith.cmpi eq, %arg3, %c0_i32_27 : i32
    %34 = arith.extui %33 : i1 to i32
    %c0_i32_28 = arith.constant 0 : i32
    %35 = arith.cmpi ne, %34, %c0_i32_28 : i32
    scf.if %35 {
      %c0_29 = arith.constant 0 : index
      %c0_30 = arith.constant 0 : index
      %36 = vector.load %arg10[%c0_29, %c0_30] : memref<8x8xf32, #tpu.memory_space<vmem>>, vector<8x8xf32>
      %c0_31 = arith.constant 0 : index
      %c0_32 = arith.constant 0 : index
      %37 = vector.load %arg9[%c0_31, %c0_32] : memref<8x1xf32, #tpu.memory_space<vmem>>, vector<8x1xf32>
      %38 = vector.broadcast %37 : vector<8x1xf32> to vector<8x8xf32>
      %39 = arith.divf %36, %38 : vector<8x8xf32>
      %40 = arith.truncf %39 : vector<8x8xf32> to vector<8x8xbf16>
      %c0_33 = arith.constant 0 : index
      %c0_34 = arith.constant 0 : index
      %c0_35 = arith.constant 0 : index
      %c0_36 = arith.constant 0 : index
      %41 = vector.load %arg7[%c0_33, %c0_34, %c0_35, %c0_36] : memref<1x1x8x8xbf16, #tpu.memory_space<vmem>>, vector<1x1x8x8xbf16>
      %42 = vector.shape_cast %41 : vector<1x1x8x8xbf16> to vector<8x8xbf16>
      %43 = vector.shape_cast %40 : vector<8x8xbf16> to vector<1x1x8x8xbf16>
      tpu.vector_store %arg7[%c0_33, %c0_34, %c0_35, %c0_36], %43 {strides = array<i32>} : memref<1x1x8x8xbf16, #tpu.memory_space<vmem>>, vector<1x1x8x8xbf16>,
    } else {
    }
    return
  }
  func.func @transform_0(%arg0: i32, %arg1: i32, %arg2: i32, %arg3: i32) -> (i32, i32, i32, i32) {
    %c0_i32 = arith.constant 0 : i32
    %c0_i32_0 = arith.constant 0 : i32
    return %arg0, %arg1, %arg2, %c0_i32 : i32, i32, i32, i32
  }
  func.func @transform_1(%arg0: i32, %arg1: i32, %arg2: i32, %arg3: i32) -> (i32, i32, i32, i32) {
    %c0_i32 = arith.constant 0 : i32
    %c0_i32_0 = arith.constant 0 : i32
    return %arg0, %arg1, %arg3, %c0_i32 : i32, i32, i32, i32
  }
  func.func @transform_2(%arg0: i32, %arg1: i32, %arg2: i32, %arg3: i32) -> (i32, i32, i32, i32) {
    %c0_i32 = arith.constant 0 : i32
    %c0_i32_0 = arith.constant 0 : i32
    return %arg0, %arg1, %arg3, %c0_i32 : i32, i32, i32, i32
  }
  func.func @transform_3(%arg0: i32, %arg1: i32, %arg2: i32, %arg3: i32) -> (i32, i32, i32, i32) {
    %c0_i32 = arith.constant 0 : i32
    %c0_i32_0 = arith.constant 0 : i32
    return %arg0, %arg1, %arg2, %c0_i32 : i32, i32, i32, i32
  }
}

module attributes {stable_mosaic.version = 11 : i64} {
  func.func @_linear_kernel(%arg0: i32, %arg1: i32, %arg2: memref<1x8x32xbf16, #tpu.memory_space<vmem>>, %arg3: memref<32x32xbf16, #tpu.memory_space<vmem>>, %arg4: memref<1x32xf32, #tpu.memory_space<vmem>>, %arg5: memref<1x8x32xf32, #tpu.memory_space<vmem>>) attributes {dimension_semantics = [#tpu.dimension_semantics<parallel>, #tpu.dimension_semantics<parallel>], iteration_bounds = array<i64: 2, 1>, scalar_prefetch = 0 : i64, scratch_operands = 0 : i64, tpu.core_type = #tpu.core_type<tc>, window_params = [{transform_indices = @transform_0, window_bounds = array<i64: 1, 8, 32>}, {pipeline_mode = #tpu.pipeline_mode<synchronous>, transform_indices = @transform_1, window_bounds = array<i64: 32, 32>}, {pipeline_mode = #tpu.pipeline_mode<synchronous>, transform_indices = @transform_2, window_bounds = array<i64: 1, 32>}, {transform_indices = @transform_3, window_bounds = array<i64: 1, 8, 32>}]} {
    %c0 = arith.constant 0 : index
    %c0_0 = arith.constant 0 : index
    %c0_1 = arith.constant 0 : index
    %0 = vector.load %arg2[%c0, %c0_0, %c0_1] : memref<1x8x32xbf16, #tpu.memory_space<vmem>>, vector<1x8x32xbf16>
    %1 = vector.shape_cast %0 : vector<1x8x32xbf16> to vector<8x32xbf16>
    %c0_2 = arith.constant 0 : index
    %c0_3 = arith.constant 0 : index
    %2 = vector.load %arg3[%c0_2, %c0_3] : memref<32x32xbf16, #tpu.memory_space<vmem>>, vector<32x32xbf16>
    %cst = arith.constant dense<0.000000e+00> : vector<8x32xf32>
    %3 = tpu.matmul %1, %2, %cst {dimension_numbers = #tpu.dot_dimension_numbers<[1], [0], [0], [1], [0, 0, 1, 1], [], []>} : vector<8x32xbf16>, vector<32x32xbf16>, vector<8x32xf32> -> vector<8x32xf32>
    %c0_4 = arith.constant 0 : index
    %c0_5 = arith.constant 0 : index
    %4 = vector.load %arg4[%c0_4, %c0_5] : memref<1x32xf32, #tpu.memory_space<vmem>>, vector<1x32xf32>
    %5 = vector.broadcast %4 : vector<1x32xf32> to vector<8x32xf32>
    %6 = arith.addf %3, %5 : vector<8x32xf32>
    %c0_6 = arith.constant 0 : index
    %c0_7 = arith.constant 0 : index
    %c0_8 = arith.constant 0 : index
    %7 = vector.load %arg5[%c0_6, %c0_7, %c0_8] : memref<1x8x32xf32, #tpu.memory_space<vmem>>, vector<1x8x32xf32>
    %8 = vector.shape_cast %7 : vector<1x8x32xf32> to vector<8x32xf32>
    %9 = vector.shape_cast %6 : vector<8x32xf32> to vector<1x8x32xf32>
    tpu.vector_store %arg5[%c0_6, %c0_7, %c0_8], %9 {strides = array<i32>} : memref<1x8x32xf32, #tpu.memory_space<vmem>>, vector<1x8x32xf32>,
    return
  }
  func.func @transform_0(%arg0: i32, %arg1: i32) -> (i32, i32, i32) {
    %c0_i32 = arith.constant 0 : i32
    %c0_i32_0 = arith.constant 0 : i32
    return %arg0, %arg1, %c0_i32 : i32, i32, i32
  }
  func.func @transform_1(%arg0: i32, %arg1: i32) -> (i32, i32) {
    %c0_i32 = arith.constant 0 : i32
    %c0_i32_0 = arith.constant 0 : i32
    %c0_i32_1 = arith.constant 0 : i32
    return %c0_i32, %c0_i32_0 : i32, i32
  }
  func.func @transform_2(%arg0: i32, %arg1: i32) -> (i32, i32) {
    %c0_i32 = arith.constant 0 : i32
    %c0_i32_0 = arith.constant 0 : i32
    %c0_i32_1 = arith.constant 0 : i32
    return %c0_i32, %c0_i32_0 : i32, i32
  }
  func.func @transform_3(%arg0: i32, %arg1: i32) -> (i32, i32, i32) {
    %c0_i32 = arith.constant 0 : i32
    %c0_i32_0 = arith.constant 0 : i32
    return %arg0, %arg1, %c0_i32 : i32, i32, i32
  }
}

</mosaic_0001>

<bundles_post_ra>
// kernel: multi_head_attention.3
= control target key start
LH: loop header
LB: loop body
LE: loop exit
PB: predicated region body
PF: predicated region fallthrough
CT: control target
= control target key end

     0   :  { %s1078_s17 = smov 0   ;;  %s1080_s18 = smov 0   ;;  %s1167_s0 = inlined_call_operand.vmem [shape: bf16[2,8,32], index: 0, kind: input, shape index: {}]   ;;  %s1168_s1 = inlined_call_operand.vmem [shape: bf16[2,8,32], index: 1, kind: input, shape index: {}]   ;;  %s1169_s2 = inlined_call_operand.vmem [shape: bf16[2,8,32], index: 2, kind: input, shape index: {}]   ;;  %s1170_s3 = inlined_call_operand.vmem [shape: bf16[32,32], index: 3, kind: input, shape index: {}]   ;;  %s1171_s4 = inlined_call_operand.vmem [shape: f32[1,32], index: 4, kind: input, shape index: {}]   ;;  %s1172_s5 = inlined_call_operand.vmem [shape: bf16[32,32], index: 5, kind: input, shape index: {}]   ;;  %s1173_s6 = inlined_call_operand.vmem [shape: f32[1,32], index: 6, kind: input, shape index: {}]   ;;  %s1174_s7 = inlined_call_operand.vmem [shape: bf16[32,32], index: 7, kind: input, shape index: {}]   ;;  %s1175_s8 = inlined_call_operand.vmem [shape: f32[1,32], index: 8, kind: input, shape index: {}]   ;;  %s1176_s9 = inlined_call_operand.vmem [shape: bf16[2,8,32], index: 9, kind: output, shape index: {0}]   ;;  %s1177_s10 = inlined_call_operand.vmem [shape: bf16[2,8,32], index: 10, kind: output, shape index: {1}]   ;;  %s1178_s11 = inlined_call_operand.vmem [shape: bf16[2,8,32], index: 11, kind: output, shape index: {2}]  }
   0x1   :  { %s1082_s19 = smov 0  }
   0x2 LB: > { %s34_s20 = sadd.s32 1, %s1010_s18  ;;  %p906_p0 = scmp.ge.s32.totalorder %s1014_s19, 1  ;;  %s1014_s19 = sphi %s1082_s19, %s22_s19   ;;  %s1010_s18 = sphi %s1080_s18, %s1180_s18   ;;  %s1006_s17 = sphi %s1078_s17, %s1179_s17  }
   0x3   : > { %p36_p1 = scmp.ge.s32.totalorder %s34_s20, 2  ;;  %p392_p2 = scmp.lt.s32.totalorder %s1014_s19, 3 }
   0x5   : > { %s1182_s20 = smov (%p36_p1, %s34_s20), 0  ;;  %p393_p3 = pnand %p906_p0, %p392_p2 }
   0x6   : > { %v986_v0 = vld [vmem:[%s1170_s3] sm:$0xff] (!%p393_p3)   ;;  %v1016_v1 = vmov (!%p393_p3), 0.0   ;;  %v987_v2 = vld [vmem:[%s1170_s3 + $0x8] sm:$0xff] (!%p393_p3)   ;;  %vm1017_vm0 = vmmov (!%p393_p3), 0   ;;  %p464_p4 = scmp.lt.s32.totalorder (!%p393_p3), %s1006_s17, 1  ;;  %vm531_vm1 = vcmask (!%p393_p3), 261120  }
   0x7   : > { %396 = sbr.rel (%p393_p3) target bundleno = 243 (0xf3), region = 56  ;;  %936 = vmatprep.subr.bf16.mxu0 (!%p393_p3), %v1016_v1  ;;  %944 = vmatprep.subr.bf16.mxu1 (!%p393_p3), %v1016_v1  ;;  %v988_v3 = vld [vmem:[%s1172_s5] sm:$0xff] (!%p393_p3)   ;;  %v990_v4 = vld [vmem:[%s1172_s5 + $0x8] sm:$0xff] (!%p393_p3)   ;;  %vm576_vm2 = vcmask (!%p393_p3), 257024  }
   0x8   : > { %937 = vmatpush3.bf16.msra.mxu0 (!%p393_p3), %v986_v0  ;;  %940 = vmatprep.mubr.msk.bf16.mxu0 (!%p393_p3), %vm1017_vm0, %v1016_v1  ;;  %v989_v5 = vld [vmem:[%s1174_s7] sm:$0xff] (!%p393_p3)   ;;  %v991_v8 = vld [vmem:[%s1174_s7 + $0x8] sm:$0xff] (!%p393_p3)  }
   0x9   : > { %938 = vmatprep.subr.bf16.mxu0 (!%p393_p3), %v1016_v1  ;;  %948 = vmatprep.mubr.msk.bf16.mxu1 (!%p393_p3), %vm1017_vm0, %v1016_v1  ;;  %v913_v10 = vld [vmem:[%s1171_s4] ss:$0 sm:$0xff] (!%p393_p3) }
   0xa   : > { %945 = vmatpush3.bf16.msra.mxu1 (!%p393_p3), %v988_v3  ;;  %v917_v12 = vld [vmem:[%s1173_s6] ss:$0 sm:$0xff] (!%p393_p3) }
   0xb   : > { %946 = vmatprep.subr.bf16.mxu1 (!%p393_p3), %v1016_v1  ;;  %v921_v24 = vld [vmem:[%s1175_s8] ss:$0 sm:$0xff] (!%p393_p3) }
   0xc   : > { %939 = vmatpush3.bf16.msra.mxu0 (!%p393_p3), %v987_v2 }
   0xd   : > { %952 = vmatprep.subr.bf16.mxu0 (!%p393_p3), %v1016_v1 }
   0xe   : > { %s1184_s17 = smov (!%p464_p4, %s1006_s17), 1  ;;  %947 = vmatpush3.bf16.msra.mxu1 %v990_v4 }
   0xf   : > { %s1110_s29 = sshll.u32 %s1184_s17, 2 }
  0x10   : > { %s470_s15 = scalar_lea.vmem %s1167_s0, %s1110_s29  ;;  %s477_s22 = scalar_lea.vmem %s1168_s1, %s1110_s29 }
  0x11   : > { %v507_v6 = vld [vmem:[%s470_s15] sm:$0xf]  ;;  %s484_s26 = scalar_lea.vmem %s1169_s2, %s1110_s29  ;;  %s491_s15 = scalar_lea.vmem %s1176_s9, %s1110_s29 }
  0x12   : > { %v578_v7 = vld [vmem:[%s477_s22] sm:$0xf]  ;;  %941 = vmatmul.mubr.msk.bf16.vlgmr.msra.gmra.mrb[0].mxu0 %vm531_vm1, %v507_v6  ;;  %s498_s22 = scalar_lea.vmem %s1177_s10, %s1110_s29 }
  0x13   : > { %953 = vmatpush3.bf16.msra.mxu0 %v989_v5  ;;  %956 = vmatprep.mubr.msk.bf16.mxu0 %vm1017_vm0, %v1016_v1  ;;  %v647_v9 = vld [vmem:[%s484_s26] sm:$0xf]  ;;  %s505_s26 = scalar_lea.vmem %s1178_s11, %s1110_s29 }
  0x14   : > { %954 = vmatprep.subr.bf16.mxu0 %v1016_v1  ;;  %949 = vmatmul.mubr.msk.bf16.vlgmr.msra.gmra.mrb[0].mxu1 %vm531_vm1, %v578_v7 }
  0x17   : > { %955 = vmatpush3.bf16.msra.mxu0 %v991_v8 }
  0x1a   : > { %957 = vmatmul.mubr.msk.bf16.vlgmr.msra.gmra.mrb[4].mxu0 %vm531_vm1, %v647_v9 }
  0xe5   : > { %v569_v11 = vpop.f32.mrb[0].mxu0 }
  0xe6   : > { %v570_v13 = vadd.f32 %v913_v10, %v569_v11  ;;  %v942_v14 = vpop.f32.mrb[1].mxu0 }
  0xe7   : > { %v572_v15 = vpop.f32.mrb[2].mxu0  ;;  %v639_v16 = vpop.f32.mrb[0].mxu1 }
  0xe8   : > { %v575_v17 = vpack.c.bf16 %v570_v13, %v570_v13  ;;  %v943_v18 = vpop.f32.mrb[3].mxu0  ;;  %v640_v19 = vadd.f32 %v917_v12, %v639_v16  ;;  %v950_v20 = vpop.f32.mrb[1].mxu1 }
  0xe9   : > { %v642_v21 = vpop.f32.mrb[2].mxu1 }
  0xea   : > { %577 = vst.msk [vmem:[%s491_s15] sm:$0xf] %vm576_vm2, %v575_v17  ;;  %v645_v22 = vpack.c.bf16 %v640_v19, %v640_v19  ;;  %v951_v23 = vpop.f32.mrb[3].mxu1 }
  0xec   : > { %646 = vst.msk [vmem:[%s498_s22] sm:$0xf] %vm576_vm2, %v645_v22 }
  0xed   : > { %v708_v25 = vpop.f32.mrb[4].mxu0 }
  0xee   : > { %v709_v26 = vadd.f32 %v921_v24, %v708_v25  ;;  %v958_v27 = vpop.f32.mrb[5].mxu0 }
  0xef   : > { %v711_v28 = vpop.f32.mrb[6].mxu0 }
  0xf0   : > { %v714_v29 = vpack.c.bf16 %v709_v26, %v709_v26  ;;  %v959_v30 = vpop.f32.mrb[7].mxu0 }
  0xf2   : > { %715 = vst.msk [vmem:[%s505_s26] sm:$0xf] %vm576_vm2, %v714_v29 }
  0xf3 PF: > { %s22_s19 = sadd.s32 1, %s1014_s19   ;;  %s1179_s17 = smov %s1010_s18 }
  0xf4   : > { %p19_p5 = scmp.ge.s32.totalorder %s22_s19, 4   ;;  %s1180_s18 = smov %s1182_s20 }
  0xf6   :  { %21 = sbr.rel (!%p19_p5) target bundleno = 2 (0x2), region = 116 }

// kernel: multi_head_attention.4
= control target key start
LH: loop header
LB: loop body
LE: loop exit
PB: predicated region body
PF: predicated region fallthrough
CT: control target
= control target key end

     0   :  { %s772_s12 = smov 0   ;;  %s774_s13 = smov 0   ;;  %s846_s0 = inlined_call_operand.vmem [shape: bf16[2,4,8,8], index: 0, kind: input, shape index: {}]   ;;  %s847_s1 = inlined_call_operand.vmem [shape: bf16[2,4,8,8], index: 1, kind: input, shape index: {}]   ;;  %s848_s2 = inlined_call_operand.vmem [shape: bf16[2,4,8,8], index: 2, kind: input, shape index: {}]   ;;  %s849_s3 = inlined_call_operand.vmem [shape: bf16[2,4,8,8], index: 3, kind: output, shape index: {}]  }
   0x1   :  { %s776_s14 = smov 0   ;;  %s778_s15 = smov 0  }
   0x2   :  { %s780_s16 = smov 0  }
   0x3 LB: > { %s35_s17 = sadd.s32 1, %s738_s14  ;;  %s39_s18 = sadd.s32 1, %s742_s15  ;;  %s746_s16 = sphi %s780_s16, %s13_s16   ;;  %s742_s15 = sphi %s778_s15, %s853_s15   ;;  %s738_s14 = sphi %s776_s14, %s852_s14   ;;  %s734_s13 = sphi %s774_s13, %s851_s13   ;;  %s730_s12 = sphi %s772_s12, %s850_s12  }
   0x4   : > { %p37_p0 = scmp.ge.s32.totalorder %s35_s17, 4  ;;  %p627_p1 = scmp.ge.s32.totalorder %s746_s16, 1 }
   0x5   : > { %p217_p2 = scmp.lt.s32.totalorder %s746_s16, 9 }
   0x6   : > { %s855_s17 = smov (%p37_p0, %s35_s17), 0  ;;  %s857_s18 = smov (!%p37_p0, %s39_s18), %s742_s15 }
   0x7   : > { %p218_p3 = pnand %p627_p1, %p217_p2  ;;  %p41_p4 = scmp.ge.s32.totalorder %s857_s18, 2 }
   0x8   : > { %p275_p5 = scmp.lt.s32.totalorder (!%p218_p3), %s734_s13, 1  ;;  %p277_p6 = scmp.lt.s32.totalorder (!%p218_p3), %s730_s12, 3  ;;  %vm327_vm0 = vcmask (!%p218_p3), 64512   ;;  %v748_v0 = vmov (!%p218_p3), 0.0   ;;  %vm749_vm1 = vmmov (!%p218_p3), 0   ;;  %vm324_vm2 = vcmask (!%p218_p3), 7168  }
   0x9   : > { %s859_s18 = smov (%p41_p4, %s857_s18), 0  ;;  %221 = sbr.rel (%p218_p3) target bundleno = 827 (0x33b), region = 32 }
   0xa   : > { %644 = vmatprep.subr.bf16.mxu0 (!%p218_p3), %v748_v0  ;;  %328 = vst.msk [vmem:[#allocation4] sm:$0xff] (!%p218_p3), %vm327_vm0, %v748_v0  ;;  %646 = vmatprep.mubr.msk.bf16.mxu0 (!%p218_p3), %vm749_vm1, %v748_v0  ;;  %v750_v4 = vmov (!%p218_p3), -inf   ;;  %v751_v10 = vmov (!%p218_p3), 0   ;;  %vm414_vm3 = vcmask (!%p218_p3), 1043456   ;;  %vm474_vm4 = vcmask (!%p218_p3), 60416  }
   0xb   : > { %650 = vmatprep.subr.bf16.mxu1 (!%p218_p3), %v748_v0  ;;  %652 = vmatprep.mubr.msk.bf16.mxu1 (!%p218_p3), %vm749_vm1, %v748_v0  ;;  %325 = vst.msk [vmem:[#allocation2] sm:$0xff] (!%p218_p3), %vm324_vm2, %v750_v4  ;;  %326 = vst.msk [vmem:[#allocation3] sm:$0xff] (!%p218_p3), %vm324_vm2, %v748_v0 }
   0xc   : > { %700 = vset.pattern.permute.xlu0 (!%p218_p3), %v751_v10  ;;  %701 = vset.pattern.permute.xlu1 (!%p218_p3), %v751_v10 }
  0x10   : > { %s861_s13 = smov (!%p275_p5, %s734_s13), 1  ;;  %s863_s12 = smov (!%p277_p6, %s730_s12), 3 }
  0x11   : > { %s628_s19 = sshll.u32 %s861_s13, 2  ;;  %v403_v30 = vld [vmem:[#allocation4] sm:$0xff] }
  0x12   : > { %s283_s20 = sadd.s32 %s628_s19, %s863_s12  ;;  %v379_v11 = vld [vmem:[#allocation2] sm:$0xff]  ;;  %v395_v25 = vld [vmem:[#allocation3] sm:$0xff] }
  0x13   : > { %s803_s21 = sshll.u32 %s283_s20, 2 }
  0x14   : > { %s296_s24 = scalar_lea.vmem %s847_s1, %s803_s21  ;;  %s285_s27 = scalar_lea.vmem %s846_s0, %s803_s21 }
  0x15   : > { %v330_v1 = vld [vmem:[%s296_s24] sm:$0xf]  ;;  %s307_s30 = scalar_lea.vmem %s848_s2, %s803_s21  ;;  %s318_s6 = scalar_lea.vmem %s849_s3, %s803_s21 }
  0x16   : > { %v337_v2 = vsel %vm327_vm0, %v330_v1, 0  ;;  %v329_v3 = vld [vmem:[%s285_s27] sm:$0xf] }
  0x17   : > { %645 = vmatpush3.bf16.xpose.msra.mxu0 %v337_v2  ;;  %v331_v15 = vld [vmem:[%s307_s30] sm:$0xf] }
  0x18   : > { %v416_v16 = vsel %vm414_vm3, %v331_v15, 0 }
  0x19   : > { %651 = vmatpush3.bf16.msra.mxu1 %v416_v16 }
  0x1e   : > { %647 = vmatmul.mubr.msk.bf16.vlgmr.msra.gmra.mrb[0].mxu0 %vm327_vm0, %v329_v3 }
  0xf1   : > { %v373_v5 = vpop.f32.mrb[0].mxu0 }
  0xf2   : > { %v648_v6 = vpop.f32.mrb[1].mxu0  ;;  %v380_v7 = vsel %vm327_vm0, %v373_v5, -inf }
  0xf3   : > { %381 = vmax.xlane.f32.xlu0 %v380_v7  ;;  %v376_v8 = vpop.f32.mrb[2].mxu0 }
  0xf4   : > { %v649_v9 = vpop.f32.mrb[3].mxu0 }
 0x180   : > { %v382_v12 = vpop.xlane.xlu0 %381 }
 0x181   : > { %v383_v13 = vmax.f32 %v379_v11, %v382_v12 }
 0x183   : > { %v384_v14 = vsub.f32 %v379_v11, %v383_v13  ;;  %460 = vst.msk [vmem:[#allocation2] sm:$0xff] %vm324_vm2, %v383_v13  ;;  %389 = vperm.xlu0 %700, %v383_v13  }
 0x185   : > { %v385_v23 = vmul.f32 1.442695, %v384_v14 }
 0x202   : > { %v390_v17 = vpop.permute.xlu0 %389 }
 0x203   : > { %v392_v18 = vsub.f32 %v373_v5, %v390_v17 }
 0x205   : > { %v393_v19 = vmul.f32 1.442695, %v392_v18 }
 0x207   : > { %702 = vpow2.f32 %v393_v19 }
 0x208   : > { %704 = vpow2.f32 %v385_v23 }
 0x211   : > { %v703_v20 = vpop.eup %702 }
 0x212   : > { %v397_v21 = vsel %vm327_vm0, %v703_v20, 0.0  ;;  %v410_v22 = vpack.c.bf16 %v703_v20, %v703_v20  ;;  %v705_v24 = vpop.eup %704 }
 0x213   : > { %398 = vadd.xlane.f32.xlu1 %v397_v21  ;;  %v396_v26 = vmul.f32 %v705_v24, %v395_v25 }
 0x214   : > { %653 = vmatmul.mubr.msk.bf16.vlgmr.msra.gmra.mrb[0].mxu1 %vm327_vm0, %v410_v22 }
 0x224   : > { %406 = vperm.xlu1 %701, %v705_v24  }
 0x2a0   : > { %v399_v27 = vpop.xlane.xlu1 %398 }
 0x2a1   : > { %v400_v28 = vadd.f32 %v399_v27, %v396_v26 }
 0x2a3   : > { %402 = vst.msk [vmem:[#allocation3] sm:$0xff] %vm324_vm2, %v400_v28 }
 0x2a4   : > { %v407_v31 = vpop.permute.xlu1 %406 }
 0x2a5   : > { %v409_v32 = vmul.f32 %v407_v31, %v403_v30 }
 0x2aa   : > { %v465_v29 = vld [vmem:[#allocation3] sm:$0xff] }
 0x2ab   : > { %468 = vperm.xlu1 %701, %v465_v29  }
 0x2e7   : > { %v452_v33 = vpop.f32.mrb[0].mxu1 }
 0x2e8   : > { %v458_v34 = vadd.f32 %v452_v33, %v409_v32  ;;  %v654_v35 = vpop.f32.mrb[1].mxu1 }
 0x2e9   : > { %v455_v36 = vpop.f32.mrb[2].mxu1 }
 0x2ea   : > { %459 = vst.msk [vmem:[#allocation4] sm:$0xff] %vm327_vm0, %v458_v34  ;;  %v655_v37 = vpop.f32.mrb[3].mxu1 }
 0x2f1   : > { %v464_v40 = vld [vmem:[#allocation4] sm:$0xff] }
 0x32a   : > { %v469_v38 = vpop.permute.xlu1 %468 }
 0x32b   : > { %706 = vrcp.f32 %v469_v38 }
 0x335   : > { %v707_v39 = vpop.eup %706 }
 0x336   : > { %v472_v41 = vmul.f32 %v707_v39, %v464_v40 }
 0x338   : > { %v473_v42 = vpack.c.bf16 %v472_v41, %v472_v41 }
 0x33a   : > { %475 = vst.msk [vmem:[%s318_s6] sm:$0xf] %vm474_vm4, %v473_v42 }
 0x33b PF: > { %s13_s16 = sadd.s32 1, %s746_s16   ;;  %s850_s12 = smov %s738_s14 }
 0x33c   : > { %p10_p7 = scmp.ge.s32.totalorder %s13_s16, 10   ;;  %s851_s13 = smov %s742_s15 }
 0x33d   : > { %s852_s14 = smov %s855_s17  ;;  %s853_s15 = smov %s859_s18 }
 0x33e   :  { %12 = sbr.rel (!%p10_p7) target bundleno = 3 (0x3), region = 76 }

// kernel: multi_head_attention.5
= control target key start
LH: loop header
LB: loop body
LE: loop exit
PB: predicated region body
PF: predicated region fallthrough
CT: control target
= control target key end

     0   :  { %8 = vsyncpa [#allocation3], 0  ;;  %s658_s0 = inlined_call_operand.vmem [shape: bf16[2,8,32], index: 0, kind: input, shape index: {}]   ;;  %s659_s1 = inlined_call_operand.vmem [shape: bf16[32,32], index: 1, kind: input, shape index: {}]   ;;  %s660_s2 = inlined_call_operand.vmem [shape: f32[1,32], index: 2, kind: input, shape index: {}]   ;;  %s661_s3 = inlined_call_operand.hbm [shape: f32[2,8,32], index: 3, kind: output, shape index: {}]  }
   0x1   :  { %10 = vsyncpa [#allocation3 + $0x1], 0  ;;  %s535_s12 = smov 0   ;;  %s537_s13 = smov 0  }
   0x2   :  { %s539_s14 = smov 0   ;;  %s541_s15 = smov 0  }
   0x3   :  { %s543_s16 = smov 0   ;;  %s545_s17 = smov 0  }
   0x4 LB: > { %s347_s18 = sadd.s32 4294967295, %s510_s17   ;;  %s348_s19 = sadd.s32 4294967294, %s510_s17   ;;  %s510_s17 = sphi %s545_s17, %s16_s17   ;;  %s506_s16 = sphi %s543_s16, %s668_s16   ;;  %s502_s15 = sphi %s541_s15, %s667_s15   ;;  %s498_s14 = sphi %s539_s14, %s666_s14   ;;  %s494_s13 = sphi %s537_s13, %s665_s13   ;;  %s490_s12 = sphi %s535_s12, %s664_s12  }
   0x5   : > { %s28_s20 = sadd.s32 1, %s506_s16  ;;  %s107_s21 = sadd.s32 1, %s498_s14 }
   0x6   : > { %p30_p0 = scmp.ge.s32.totalorder %s28_s20, 2  ;;  %p117_p1 = scmp.ne.s32.totalorder %s498_s14, %s494_s13 }
   0x7   : > { %p118_p2 = scmp.eq.s32.totalorder %s347_s18, 1  ;;  %p123_p3 = scmp.ne.s32.totalorder %s494_s13, %s490_s12 }
   0x8   : > { %s670_s20 = smov (%p30_p0, %s28_s20), 0  ;;  %p124_p5 = scmp.eq.s32.totalorder %s348_s19, 1 }
   0x9   : > { %p575_p4 = por %p118_p2, %p117_p1  ;;  %s102_s23 = ssub.s32 %s506_s16, %s670_s20 }
   0xa   : > { %p351_p6 = scmp.ge.s32.totalorder %s510_s17, 1  ;;  %p105_p7 = scmp.eq.s32.totalorder %s102_s23, 0 }
   0xb   : > { %p582_p8 = por %p124_p5, %p123_p3  ;;  %p158_p9 = scmp.lt.s32.totalorder %s510_s17, 3 }
   0xc   : > { %s588_s25 = scalar_select %p105_p7, %s498_s14, %s107_s21  }
   0xd   : > { %p159_p10 = pnand %p351_p6, %p158_p9 }
   0xe   : > { %v430_v0 = vld [vmem:[%s659_s1] sm:$0xff] (!%p159_p10)   ;;  %v512_v1 = vmov (!%p159_p10), 0.0   ;;  %v431_v2 = vld [vmem:[%s659_s1 + $0x8] sm:$0xff] (!%p159_p10)   ;;  %vm513_vm0 = vmmov (!%p159_p10), 0   ;;  %p184_p11 = scmp.lt.s32.totalorder (!%p159_p10), %s502_s15, 1  ;;  %vm216_vm1 = vcmask (!%p159_p10), 261120  }
   0xf   : > { %162 = sbr.rel (%p159_p10) target bundleno = 255 (0xff), region = 32  ;;  %365 = vmatprep.subr.bf16.mxu0 (!%p159_p10), %v512_v1  ;;  %369 = vmatprep.mubr.msk.bf16.mxu0 (!%p159_p10), %vm513_vm0, %v512_v1  ;;  %s181_s8 = sand.u32 (!%p159_p10), 1, %s494_s13   ;;  %v354_v4 = vld [vmem:[%s660_s2] ss:$0 sm:$0xff] (!%p159_p10) }
  0x10   : > { %366 = vmatpush3.bf16.msra.mxu0 (!%p159_p10), %v430_v0  ;;  %s352_s9 = sshll.u32 (!%p159_p10), %s181_s8, 3  ;;  %s359_s18 = sshll.u32 (!%p159_p10), %s502_s15, 7 }
  0x11   : > { %367 = vmatprep.subr.bf16.mxu0 (!%p159_p10), %v512_v1  ;;  %s183_s19 = scalar_lea.vmem (!%p159_p10), [#allocation2], %s352_s9  ;;  %s610_s27 = scalar_lea.hbm (!%p159_p10), %s661_s3, %s359_s18 }
  0x12   : > { %s276_s21 = sshll.u32 (!%p159_p10), %s183_s19, 4  ;;  %s514_s29 = smov (!%p159_p10), [#allocation2]   ;;  %s612_s21 = int_to_ptr.vmem [resolvable:$true] %s276_s21 }
  0x13   : > { %s432_s28 = scalar_lea.vmem (!%p159_p10), %s612_s21, 128 }
  0x14   : > { %368 = vmatpush3.bf16.msra.mxu0 (!%p159_p10), %v431_v2  ;;  %p433_p12 = scmp.ne.s32.totalorder (!%p159_p10), %s612_s21, %s432_s28 }
  0x16   : > { %s185_s30 = scalar_select %p184_p11, %s502_s15, 1 }
  0x17   : > { %s262_s15 = scalar_lea.sflag [#allocation3], %s181_s8  ;;  %p434_p13 = pnand %p433_p12, %p575_p4 }
  0x18   : > { %s353_s4 = sshll.u32 %s185_s30, 2  ;;  %s436_s30 = sshll.u32 %s514_s29, 4  ;;  %s437_s30 = int_to_ptr.vmem [resolvable:$false] %s436_s30 }
  0x19   : > { %s190_s7 = scalar_lea.vmem %s658_s0, %s353_s4  ;;  %p435_p0 = pneg %p434_p13 }
  0x1a   : > { %v192_v3 = vld [vmem:[%s190_s7] sm:$0xf]  ;;  %s438_s4 = scalar_lea.vmem %s437_s30, 256  ;;  %p439_p1 = scmp.lt.s32.totalorder %s612_s21, %s437_s30 }
  0x1b   : > { %370 = vmatmul.mubr.msk.bf16.vlgmr.msra.gmra.mrb[0].mxu0 %vm216_vm1, %v192_v3  ;;  %p440_p2 = scmp.lt.s32.totalorder %s438_s4, %s432_s28 }
  0x1d   : > { %p441_p3 = por %p440_p2, %p439_p1 }
  0x1f   : > { %p442_p5 = pnand %p441_p3, %p435_p0 }
  0xee   : > { %v254_v5 = vpop.f32.mrb[0].mxu0 }
  0xef   : > { %v255_v6 = vadd.f32 %v354_v4, %v254_v5  ;;  %v371_v7 = vpop.f32.mrb[1].mxu0 }
  0xf0   : > { %v257_v8 = vpop.f32.mrb[2].mxu0 }
  0xf1   : > { %v372_v9 = vpop.f32.mrb[3].mxu0  ;;  %260 = vst.msk [vmem:[%s183_s19] sm:$0xff] %vm216_vm1, %v255_v6 }
  0xf2   : > { %445 = shalt.err (!%p442_p5)
}
  0xf3   : > { %s446_s5 = scalar_lea.hbm %s610_s27, 128  ;;  %s450_s8 = scalar_lea.hbm %s661_s3, 256 }
  0xf4   : > { %p447_p6 = scmp.ne.s32.totalorder %s610_s27, %s446_s5  ;;  %p451_p10 = scmp.lt.u32.totalorder %s610_s27, %s661_s3 }
  0xf5   : > { %p452_p11 = scmp.lt.u32.totalorder %s450_s8, %s446_s5  ;;  %p454_p13 = scmp.lt.u32.totalorder %s446_s5, %s610_s27 }
  0xf6   : > { %p448_p7 = pnand %p447_p6, %p575_p4 }
  0xf7   : > { %p453_p12 = por %p452_p11, %p451_p10 }
  0xf8   : > { %p449_p9 = pneg %p448_p7 }
  0xf9   : > { %p455_p0 = por %p454_p13, %p453_p12 }
  0xfb   : > { %p456_p1 = pnand %p455_p0, %p449_p9 }
  0xfd   : > { %459 = shalt.err (!%p456_p1)
}
  0xfe   : > { %373 = dma.vmem_to_hbm [thread:$0]  (%p575_p4), %s612_s21, 128, %s610_s27, %s262_s15  }
  0xff PF: > { %p379_p2 = scmp.ge.s32.totalorder %s510_s17, 2  ;;  %s288_s11 = sand.u32 1, %s490_s12  }
 0x100   : > { %s289_s18 = scalar_lea.sflag [#allocation3], %s288_s11 }
 0x101   : > { %p376_p3 = pnand %p379_p2, %p582_p8 }
 0x103   : > { %485 = dma.done.wait (!%p376_p3), %s289_s18, 128  }
 0x104   : > { %487 = vsyncadd (!%p376_p3), %s289_s18, 4294967168  ;;  %s16_s17 = sadd.s32 1, %s510_s17   ;;  %s664_s12 = smov %s494_s13 }
 0x105   : > { %p13_p5 = scmp.ge.s32.totalorder %s16_s17, 4   ;;  %s665_s13 = smov %s498_s14 }
 0x106   : > { %s666_s14 = smov %s588_s25  ;;  %s667_s15 = smov %s506_s16 }
 0x107   : > { %s668_s16 = smov %s670_s20  ;;  %15 = sbr.rel (!%p13_p5) target bundleno = 4 (0x4), region = 67 }
 0x10e   :  { %294 = vsyncpa [#allocation3], 1 }
 0x10f   :  { %296 = vsyncpa [#allocation3 + $0x1], 1 }

</bundles_post_ra>
